<compile_context>
chip_gen: v6e
topology: v6e:2x2x1
jax: 0.10.0
libtpu: 0.0.40
codegen_flags: <defaults>
</compile_context>

<pallas_src>
import jax
import jax.numpy as jnp
from jax.experimental import pallas as pl
from jax.experimental.pallas import tpu as pltpu

_W4_PAD = 128  # lane width of the fc4 matmul operand in VMEM (not in HBM out)


def _round_up(n, m):
    return (n + m - 1) // m * m


def _num_tensorcores():
    """Best-effort TensorCore count (2 on v7x megacore, else 1)."""
    try:
        return max(1, int(getattr(jax.devices()[0], "num_cores", 1)))
    except Exception:  # pragma: no cover - defensive
        return 1


def mlp_kernel(x_ref, w1_ref, b1_ref, w2_ref, b2_ref,
               w3_ref, b3_ref, w4_ref, b4_ref, o_ref):
    """Whole 4-layer MLP fused in one kernel invocation per batch tile.
    Weights + the tile's activations all live in VMEM."""
    def layer(h, w_ref, b_ref, relu):
        y = jnp.dot(h, w_ref[...],
                    preferred_element_type=jnp.float32) + b_ref[...]
        return jnp.maximum(y, 0.0) if relu else y

    h = layer(x_ref[...], w1_ref, b1_ref, True)    # (tile, 64)
    h = layer(h, w2_ref, b2_ref, True)             # (tile, 64)
    h = layer(h, w3_ref, b3_ref, True)             # (tile, 64)
    out = layer(h, w4_ref, b4_ref, False)          # (tile, 128) padded lanes
    # Store only the real output lanes; the HBM output array is (B_pad, 3).
    o_ref[...] = out[:, :o_ref.shape[1]].astype(o_ref.dtype)


def prepare_params(params, pad=_W4_PAD):
    """Pad fc4 to a lane-dense matmul width ONCE (call outside the hot loop).
    Returns (padded_param_tuple, true_output_dim)."""
    w1, b1, w2, b2, w3, b3, w4, b4 = params
    dout = w4.shape[1]
    w4p = jnp.zeros((w4.shape[0], pad), w4.dtype).at[:, :dout].set(w4)
    b4p = jnp.zeros((1, pad), b4.dtype).at[:, :dout].set(b4)
    return (w1, b1, w2, b2, w3, b3, w4p, b4p), dout


def net_forward(x, prepared, *, batch_tile=4096, latency_threshold=512):
    """x: (B, 8) float32, prepared = prepare_params(params).
    Returns (B, 3) float32."""
    (w1, b1, w2, b2, w3, b3, w4p, b4p), dout = prepared
    B, Din = x.shape
    assert Din == w1.shape[0]

    num_cores = _num_tensorcores()
    batch_tile = _round_up(max(batch_tile, 8), 8)

    # --- batch tiling -------------------------------------------------------
    if B <= latency_threshold:
        if num_cores >= 2 and B > 128:
            # v7x: two parallel steps so both TensorCores get work.
            tile = _round_up(pl.cdiv(B, 2), 8)
        else:
            # single grid step: no pipeline prologue/epilogue.
            tile = _round_up(max(B, 8), 8)
    else:
        tile = min(batch_tile, _round_up(B, 8))
        if num_cores >= 2:
            tile = min(tile, _round_up(pl.cdiv(B, 2), 8))

    B_pad = _round_up(B, tile)
    if B_pad != B:
        x = jnp.pad(x, ((0, B_pad - B), (0, 0)))
    grid = (B_pad // tile,)

    # --- advisory cost estimate ----------------------------------------------
    per_row_flops = 2 * (Din * 64 + 64 * 64 + 64 * 64 + 64 * _W4_PAD)
    weight_bytes = sum(int(a.size) * int(a.dtype.itemsize)
                       for a in (w1, b1, w2, b2, w3, b3, w4p, b4p))
    cost = pl.CostEstimate(
        flops=int(B_pad) * per_row_flops,
        transcendentals=0,
        bytes_accessed=int(B_pad) * (Din + dout) * 4 + weight_bytes)

    def const_spec(shape):
        # Constant block (0, 0): DMA'd once, VMEM-resident across the grid.
        return pl.BlockSpec(shape, lambda i: (0, 0))

    out = pl.pallas_call(
        mlp_kernel,
        out_shape=jax.ShapeDtypeStruct((B_pad, dout), jnp.float32),
        grid_spec=pltpu.PrefetchScalarGridSpec(
            num_scalar_prefetch=0,
            grid=grid,
            in_specs=[
                pl.BlockSpec((tile, Din), lambda i: (i, 0)),   # x tile
                const_spec(w1.shape), const_spec(b1.shape),
                const_spec(w2.shape), const_spec(b2.shape),
                const_spec(w3.shape), const_spec(b3.shape),
                const_spec(w4p.shape), const_spec(b4p.shape),
            ],
            # Last block dim == full array dim (3): legal, and HBM write is
            # exactly the useful 12 B/row.
            out_specs=pl.BlockSpec((tile, dout), lambda i: (i, 0)),
        ),
        compiler_params=pltpu.CompilerParams(
            dimension_semantics=("parallel",),
            vmem_limit_bytes=32 * 1024 * 1024),
        cost_estimate=cost,
    )(x, w1, b1, w2, b2, w3, b3, w4p, b4p)

    return out if B_pad == B else out[:B]


def init_params(key):
    """Deterministic synthetic params matching PyTorch Linear shapes
    (stored transposed: (in, out))."""
    dims = [(8, 64), (64, 64), (64, 64), (64, 3)]
    params = []
    for din, dout in dims:
        kw, kb, key = jax.random.split(key, 3)
        bound = 1.0 / (din ** 0.5)  # same scale as torch.nn.Linear default
        w = jax.random.uniform(kw, (din, dout), jnp.float32, -bound, bound)
        b = jax.random.uniform(kb, (1, dout), jnp.float32, -bound, bound)
        params += [w, b]
    return tuple(params)


def reference_forward(x, params):
    w1, b1, w2, b2, w3, b3, w4, b4 = params
    h = jnp.maximum(x @ w1 + b1, 0.0)
    h = jnp.maximum(h @ w2 + b2, 0.0)
    h = jnp.maximum(h @ w3 + b3, 0.0)
    return h @ w4 + b4


if __name__ == "__main__":
    key = jax.random.PRNGKey(0)
    kx1, kx2, kp = jax.random.split(key, 3)
    params = init_params(kp)
    prepared = prepare_params(params)   # fc4 padding done once, outside calls

    # 1) small-batch latency path: single grid step (>=2 on v7x).
    B_small = 16
    x_small = jax.random.normal(kx1, (B_small, 8), jnp.float32)
    out_small = jax.block_until_ready(net_forward(x_small, prepared))
    ref_small = reference_forward(x_small, params)
    assert out_small.shape == (B_small, 3), out_small.shape
    assert jnp.allclose(out_small, ref_small, atol=1e-5, rtol=1e-5), \
        "small-batch mismatch vs reference"

    # 2) tiled throughput path: ragged batch, zero padding, multiple steps.
    B_big = 600
    x_big = jax.random.normal(kx2, (B_big, 8), jnp.float32)
    out_big = jax.block_until_ready(
        net_forward(x_big, prepared, batch_tile=256, latency_threshold=128))
    ref_big = reference_forward(x_big, params)
    assert out_big.shape == (B_big, 3), out_big.shape
    assert jnp.allclose(out_big, ref_big, atol=1e-4, rtol=1e-4), \
        "tiled-batch mismatch vs reference"

    print("KERNEL_OK")
</pallas_src>

<mosaic_0001>
module attributes {stable_mosaic.version = 11 : i64} {
  func.func @mlp_kernel(%arg0: i32, %arg1: memref<16x8xf32, #tpu.memory_space<vmem>>, %arg2: memref<8x64xf32, #tpu.memory_space<vmem>>, %arg3: memref<1x64xf32, #tpu.memory_space<vmem>>, %arg4: memref<64x64xf32, #tpu.memory_space<vmem>>, %arg5: memref<1x64xf32, #tpu.memory_space<vmem>>, %arg6: memref<64x64xf32, #tpu.memory_space<vmem>>, %arg7: memref<1x64xf32, #tpu.memory_space<vmem>>, %arg8: memref<64x128xf32, #tpu.memory_space<vmem>>, %arg9: memref<1x128xf32, #tpu.memory_space<vmem>>, %arg10: memref<16x3xf32, #tpu.memory_space<vmem>>) attributes {dimension_semantics = [#tpu.dimension_semantics<parallel>], iteration_bounds = array<i64: 1>, scalar_prefetch = 0 : i64, scratch_operands = 0 : i64, tpu.core_type = #tpu.core_type<tc>, window_params = [{transform_indices = @transform_0, window_bounds = array<i64: 16, 8>}, {pipeline_mode = #tpu.pipeline_mode<synchronous>, transform_indices = @transform_1, window_bounds = array<i64: 8, 64>}, {pipeline_mode = #tpu.pipeline_mode<synchronous>, transform_indices = @transform_2, window_bounds = array<i64: 1, 64>}, {pipeline_mode = #tpu.pipeline_mode<synchronous>, transform_indices = @transform_3, window_bounds = array<i64: 64, 64>}, {pipeline_mode = #tpu.pipeline_mode<synchronous>, transform_indices = @transform_4, window_bounds = array<i64: 1, 64>}, {pipeline_mode = #tpu.pipeline_mode<synchronous>, transform_indices = @transform_5, window_bounds = array<i64: 64, 64>}, {pipeline_mode = #tpu.pipeline_mode<synchronous>, transform_indices = @transform_6, window_bounds = array<i64: 1, 64>}, {pipeline_mode = #tpu.pipeline_mode<synchronous>, transform_indices = @transform_7, window_bounds = array<i64: 64, 128>}, {pipeline_mode = #tpu.pipeline_mode<synchronous>, transform_indices = @transform_8, window_bounds = array<i64: 1, 128>}, {transform_indices = @transform_9, window_bounds = array<i64: 16, 3>}]} {
    %c0 = arith.constant 0 : index
    %c0_0 = arith.constant 0 : index
    %0 = vector.load %arg1[%c0, %c0_0] : memref<16x8xf32, #tpu.memory_space<vmem>>, vector<16x8xf32>
    %c0_1 = arith.constant 0 : index
    %c0_2 = arith.constant 0 : index
    %1 = vector.load %arg2[%c0_1, %c0_2] : memref<8x64xf32, #tpu.memory_space<vmem>>, vector<8x64xf32>
    %cst = arith.constant dense<0.000000e+00> : vector<16x64xf32>
    %2 = tpu.matmul %0, %1, %cst {dimension_numbers = #tpu.dot_dimension_numbers<[1], [0], [0], [1], [0, 0, 1, 1], [], []>} : vector<16x8xf32>, vector<8x64xf32>, vector<16x64xf32> -> vector<16x64xf32>
    %c0_3 = arith.constant 0 : index
    %c0_4 = arith.constant 0 : index
    %3 = vector.load %arg3[%c0_3, %c0_4] : memref<1x64xf32, #tpu.memory_space<vmem>>, vector<1x64xf32>
    %4 = vector.broadcast %3 : vector<1x64xf32> to vector<16x64xf32>
    %5 = arith.addf %2, %4 : vector<16x64xf32>
    %cst_5 = arith.constant 0.000000e+00 : f32
    %6 = vector.broadcast %cst_5 : f32 to vector<16x64xf32>
    %7 = arith.maximumf %5, %6 : vector<16x64xf32>
    %c0_6 = arith.constant 0 : index
    %c0_7 = arith.constant 0 : index
    %8 = vector.load %arg4[%c0_6, %c0_7] : memref<64x64xf32, #tpu.memory_space<vmem>>, vector<64x64xf32>
    %cst_8 = arith.constant dense<0.000000e+00> : vector<16x64xf32>
    %9 = tpu.matmul %7, %8, %cst_8 {dimension_numbers = #tpu.dot_dimension_numbers<[1], [0], [0], [1], [0, 0, 1, 1], [], []>} : vector<16x64xf32>, vector<64x64xf32>, vector<16x64xf32> -> vector<16x64xf32>
    %c0_9 = arith.constant 0 : index
    %c0_10 = arith.constant 0 : index
    %10 = vector.load %arg5[%c0_9, %c0_10] : memref<1x64xf32, #tpu.memory_space<vmem>>, vector<1x64xf32>
    %11 = vector.broadcast %10 : vector<1x64xf32> to vector<16x64xf32>
    %12 = arith.addf %9, %11 : vector<16x64xf32>
    %cst_11 = arith.constant 0.000000e+00 : f32
    %13 = vector.broadcast %cst_11 : f32 to vector<16x64xf32>
    %14 = arith.maximumf %12, %13 : vector<16x64xf32>
    %c0_12 = arith.constant 0 : index
    %c0_13 = arith.constant 0 : index
    %15 = vector.load %arg6[%c0_12, %c0_13] : memref<64x64xf32, #tpu.memory_space<vmem>>, vector<64x64xf32>
    %cst_14 = arith.constant dense<0.000000e+00> : vector<16x64xf32>
    %16 = tpu.matmul %14, %15, %cst_14 {dimension_numbers = #tpu.dot_dimension_numbers<[1], [0], [0], [1], [0, 0, 1, 1], [], []>} : vector<16x64xf32>, vector<64x64xf32>, vector<16x64xf32> -> vector<16x64xf32>
    %c0_15 = arith.constant 0 : index
    %c0_16 = arith.constant 0 : index
    %17 = vector.load %arg7[%c0_15, %c0_16] : memref<1x64xf32, #tpu.memory_space<vmem>>, vector<1x64xf32>
    %18 = vector.broadcast %17 : vector<1x64xf32> to vector<16x64xf32>
    %19 = arith.addf %16, %18 : vector<16x64xf32>
    %cst_17 = arith.constant 0.000000e+00 : f32
    %20 = vector.broadcast %cst_17 : f32 to vector<16x64xf32>
    %21 = arith.maximumf %19, %20 : vector<16x64xf32>
    %c0_18 = arith.constant 0 : index
    %c0_19 = arith.constant 0 : index
    %22 = vector.load %arg8[%c0_18, %c0_19] : memref<64x128xf32, #tpu.memory_space<vmem>>, vector<64x128xf32>
    %cst_20 = arith.constant dense<0.000000e+00> : vector<16x128xf32>
    %23 = tpu.matmul %21, %22, %cst_20 {dimension_numbers = #tpu.dot_dimension_numbers<[1], [0], [0], [1], [0, 0, 1, 1], [], []>} : vector<16x64xf32>, vector<64x128xf32>, vector<16x128xf32> -> vector<16x128xf32>
    %c0_21 = arith.constant 0 : index
    %c0_22 = arith.constant 0 : index
    %24 = vector.load %arg9[%c0_21, %c0_22] : memref<1x128xf32, #tpu.memory_space<vmem>>, vector<1x128xf32>
    %25 = vector.broadcast %24 : vector<1x128xf32> to vector<16x128xf32>
    %26 = arith.addf %23, %25 : vector<16x128xf32>
    %27 = vector.extract_strided_slice %26 {offsets = [0, 0], sizes = [16, 3], strides = [1, 1]} : vector<16x128xf32> to vector<16x3xf32>
    %c0_23 = arith.constant 0 : index
    %c0_24 = arith.constant 0 : index
    %28 = vector.load %arg10[%c0_23, %c0_24] : memref<16x3xf32, #tpu.memory_space<vmem>>, vector<16x3xf32>
    tpu.vector_store %arg10[%c0_23, %c0_24], %27 {strides = array<i32>} : memref<16x3xf32, #tpu.memory_space<vmem>>, vector<16x3xf32>,
    return
  }
  func.func @transform_0(%arg0: i32) -> (i32, i32) {
    %c0_i32 = arith.constant 0 : i32
    %c0_i32_0 = arith.constant 0 : i32
    return %arg0, %c0_i32 : i32, i32
  }
  func.func @transform_1(%arg0: i32) -> (i32, i32) {
    %c0_i32 = arith.constant 0 : i32
    %c0_i32_0 = arith.constant 0 : i32
    %c0_i32_1 = arith.constant 0 : i32
    return %c0_i32, %c0_i32_0 : i32, i32
  }
  func.func @transform_2(%arg0: i32) -> (i32, i32) {
    %c0_i32 = arith.constant 0 : i32
    %c0_i32_0 = arith.constant 0 : i32
    %c0_i32_1 = arith.constant 0 : i32
    return %c0_i32, %c0_i32_0 : i32, i32
  }
  func.func @transform_3(%arg0: i32) -> (i32, i32) {
    %c0_i32 = arith.constant 0 : i32
    %c0_i32_0 = arith.constant 0 : i32
    %c0_i32_1 = arith.constant 0 : i32
    return %c0_i32, %c0_i32_0 : i32, i32
  }
  func.func @transform_4(%arg0: i32) -> (i32, i32) {
    %c0_i32 = arith.constant 0 : i32
    %c0_i32_0 = arith.constant 0 : i32
    %c0_i32_1 = arith.constant 0 : i32
    return %c0_i32, %c0_i32_0 : i32, i32
  }
  func.func @transform_5(%arg0: i32) -> (i32, i32) {
    %c0_i32 = arith.constant 0 : i32
    %c0_i32_0 = arith.constant 0 : i32
    %c0_i32_1 = arith.constant 0 : i32
    return %c0_i32, %c0_i32_0 : i32, i32
  }
  func.func @transform_6(%arg0: i32) -> (i32, i32) {
    %c0_i32 = arith.constant 0 : i32
    %c0_i32_0 = arith.constant 0 : i32
    %c0_i32_1 = arith.constant 0 : i32
    return %c0_i32, %c0_i32_0 : i32, i32
  }
  func.func @transform_7(%arg0: i32) -> (i32, i32) {
    %c0_i32 = arith.constant 0 : i32
    %c0_i32_0 = arith.constant 0 : i32
    %c0_i32_1 = arith.constant 0 : i32
    return %c0_i32, %c0_i32_0 : i32, i32
  }
  func.func @transform_8(%arg0: i32) -> (i32, i32) {
    %c0_i32 = arith.constant 0 : i32
    %c0_i32_0 = arith.constant 0 : i32
    %c0_i32_1 = arith.constant 0 : i32
    return %c0_i32, %c0_i32_0 : i32, i32
  }
  func.func @transform_9(%arg0: i32) -> (i32, i32) {
    %c0_i32 = arith.constant 0 : i32
    %c0_i32_0 = arith.constant 0 : i32
    return %arg0, %c0_i32 : i32, i32
  }
}

</mosaic_0001>

<bundles_post_ra>
// kernel: tpu_custom_call.1
= control target key start
LH: loop header
LB: loop body
LE: loop exit
PB: predicated region body
PF: predicated region fallthrough
CT: control target
= control target key end

     0   :  { %14 = vsyncpa [#allocation3], 0  ;;  %s742_s0 = inlined_call_operand.vmem [shape: f32[16,8], index: 0, kind: input, shape index: {}]   ;;  %s743_s1 = inlined_call_operand.vmem [shape: f32[8,64], index: 1, kind: input, shape index: {}]   ;;  %s744_s2 = inlined_call_operand.vmem [shape: f32[1,64], index: 2, kind: input, shape index: {}]   ;;  %s745_s3 = inlined_call_operand.hbm [shape: f32[64,64], index: 3, kind: input, shape index: {}]   ;;  %s746_s4 = inlined_call_operand.vmem [shape: f32[1,64], index: 4, kind: input, shape index: {}]   ;;  %s747_s5 = inlined_call_operand.hbm [shape: f32[64,64], index: 5, kind: input, shape index: {}]   ;;  %s748_s6 = inlined_call_operand.vmem [shape: f32[1,64], index: 6, kind: input, shape index: {}]   ;;  %s749_s7 = inlined_call_operand.hbm [shape: f32[64,128], index: 7, kind: input, shape index: {}]   ;;  %s750_s8 = inlined_call_operand.vmem [shape: f32[1,128], index: 8, kind: input, shape index: {}]   ;;  %s751_s9 = inlined_call_operand.vmem [shape: f32[16,3], index: 9, kind: output, shape index: {}]  }
   0x1   :  { %15 = vsyncpa [#allocation5], 0  ;;  %s645_s30 = smov [#allocation4]   ;;  %s646_s11 = smov [#allocation2]  }
   0x2   :  { %s41_s10 = sshll.u32 %s645_s30, 4  ;;  %s27_s12 = sshll.u32 %s646_s11, 4  ;;  %s42_s10 = int_to_ptr.vmem [resolvable:$true] %s41_s10  ;;  %s28_s12 = int_to_ptr.vmem [resolvable:$true] %s27_s12 }
   0x3   :  { %s589_s13 = scalar_lea.vmem %s42_s10, 1024  ;;  %p594_p1 = scmp.lt.s32.totalorder %s42_s10, %s42_s10 }
   0x4   :  { %p590_p0 = scmp.ne.s32.totalorder %s42_s10, %s589_s13  ;;  %p595_p2 = scmp.lt.s32.totalorder %s589_s13, %s589_s13 }
   0x6   :  { %p596_p3 = por %p595_p2, %p594_p1 }
   0x8   :  { %p597_p4 = pnand %p596_p3, %p590_p0 }
   0xa   :  { %600 = shalt.err (!%p597_p4)
}
   0xb   :  { %s647_s14 = smov 128   ;;  %s648_s15 = smov 8  }
   0xc   :  { %47 = dma.hbm_to_vmem [thread:$0]  %s747_s5, 1024, %s42_s10, [#allocation5], %s647_s14, %s647_s14, %s648_s15  }
   0xd   :  { %s609_s18 = scalar_lea.vmem %s28_s12, 1024  ;;  %p614_p6 = scmp.lt.s32.totalorder %s28_s12, %s28_s12 }
   0xe   :  { %p610_p5 = scmp.ne.s32.totalorder %s28_s12, %s609_s18  ;;  %p615_p7 = scmp.lt.s32.totalorder %s609_s18, %s609_s18 }
  0x10   :  { %p616_p8 = por %p615_p7, %p614_p6 }
  0x12   :  { %p617_p9 = pnand %p616_p8, %p610_p5 }
  0x14   :  { %620 = shalt.err (!%p617_p9)
}
  0x15   :  { %33 = dma.hbm_to_vmem [thread:$0]  %s745_s3, 1024, %s28_s12, [#allocation3], %s647_s14, %s647_s14, %s648_s15  }
  0x16   :  { %s649_s21 = smov [#allocation6]  }
  0x17   :  { %s55_s22 = sshll.u32 %s649_s21, 4  ;;  %s56_s22 = int_to_ptr.vmem [resolvable:$true] %s55_s22 }
  0x18   :  { %s629_s23 = scalar_lea.vmem %s56_s22, 1024  ;;  %p634_p11 = scmp.lt.s32.totalorder %s56_s22, %s56_s22 }
  0x19   :  { %p630_p10 = scmp.ne.s32.totalorder %s56_s22, %s629_s23  ;;  %p635_p12 = scmp.lt.s32.totalorder %s629_s23, %s629_s23 }
  0x1b   :  { %p636_p13 = por %p635_p12, %p634_p11 }
  0x1d   :  { %p637_p0 = pnand %p636_p13, %p630_p10 }
  0x1f   :  { %640 = shalt.err (!%p637_p0)
}
  0x20   :  { %61 = dma.hbm_to_vmem [thread:$0]  %s749_s7, 1024, %s56_s22, [#allocation5], %s647_s14, %s647_s14, %s648_s15  }
  0x21   :  { %641 = dma.done.wait [#allocation3], 1024  }
  0x22   :  { %642 = vsyncadd [#allocation3], 4294966272 }
  0x23   :  { %643 = dma.done.wait [#allocation5], 2048  }
  0x24   :  { %644 = vsyncadd [#allocation5], 4294965248  ;;  %vm83_vm0 = vcmask 64512   ;;  %v75_v0 = vld [vmem:[%s743_s1] sm:$0xff]  ;;  %v74_v2 = vld [vmem:[%s742_s0 + $0x8] sm:$0xff]  ;;  %vm182_vm1 = vcmask 523264  }
  0x25   :  { %v73_v1 = vld [vmem:[%s742_s0] sm:$0xff]  ;;  %514 = vmatprep.subr.mxu0 %v75_v0  ;;  %v174_v3 = vld [vmem:[#allocation2 + $0x38] sm:$0xff]  ;;  %v173_v4 = vld [vmem:[#allocation2 + $0x30] sm:$0xff]  ;;  %vm460_vm2 = vcmask 23552  }
  0x26   :  { %516 = vmatprep.mubr.msk.f32.mxu0 %vm83_vm0, %v73_v1  ;;  %515 = vmatpush3.msra.mxu0 %v75_v0  ;;  %v172_v5 = vld [vmem:[#allocation2 + $0x28] sm:$0xff]  ;;  %v171_v6 = vld [vmem:[#allocation2 + $0x20] sm:$0xff]  ;;  %v170_v7 = vld [vmem:[#allocation2 + $0x18] sm:$0xff] }
  0x27   :  { %519 = vmatprep.subr.mxu1 %v174_v3  ;;  %517 = vmatmul.mubr.msk.f32.vlgmr.msra.gmra.mxu0 %vm83_vm0, %v74_v2  ;;  %v169_v8 = vld [vmem:[#allocation2 + $0x10] sm:$0xff]  ;;  %v168_v9 = vld [vmem:[#allocation2 + $0x8] sm:$0xff]  ;;  %v167_v10 = vld [vmem:[#allocation2] sm:$0xff] }
  0x28   :  { %520 = vmatpush3.msra.mxu1 %v174_v3  ;;  %v273_v11 = vld [vmem:[#allocation4 + $0x38] sm:$0xff]  ;;  %v272_v12 = vld [vmem:[#allocation4 + $0x30] sm:$0xff]  ;;  %v271_v13 = vld [vmem:[#allocation4 + $0x28] sm:$0xff] }
  0x29   :  { %521 = vmatprep.subr.mxu1 %v173_v4  ;;  %538 = vmatprep.subr.mxu0 %v273_v11  ;;  %v270_v14 = vld [vmem:[#allocation4 + $0x20] sm:$0xff]  ;;  %v269_v22 = vld [vmem:[#allocation4 + $0x18] sm:$0xff]  ;;  %v268_v23 = vld [vmem:[#allocation4 + $0x10] sm:$0xff] }
  0x2a   :  { %522 = vmatpush3.msra.mxu1 %v173_v4  ;;  %539 = vmatpush3.msra.mxu0 %v273_v11  ;;  %v469_v15 = vld [vmem:[%s744_s2] ss:$0 sm:$0xff]  ;;  %v267_v24 = vld [vmem:[#allocation4 + $0x8] sm:$0xff]  ;;  %v371_v26 = vld [vmem:[#allocation6 + $0x38] sm:$0xff] }
  0x2b   :  { %523 = vmatprep.subr.mxu1 %v172_v5  ;;  %540 = vmatprep.subr.mxu0 %v272_v12  ;;  %v266_v25 = vld [vmem:[#allocation4] sm:$0xff]  ;;  %v370_v27 = vld [vmem:[#allocation6 + $0x30] sm:$0xff]  ;;  %v369_v28 = vld [vmem:[#allocation6 + $0x28] sm:$0xff] }
  0x2c   :  { %524 = vmatpush3.msra.mxu1 %v172_v5  ;;  %541 = vmatpush3.msra.mxu0 %v272_v12  ;;  %v368_v29 = vld [vmem:[#allocation6 + $0x20] sm:$0xff]  ;;  %v367_v37 = vld [vmem:[#allocation6 + $0x18] sm:$0xff]  ;;  %v366_v38 = vld [vmem:[#allocation6 + $0x10] sm:$0xff] }
  0x2d   :  { %525 = vmatprep.subr.mxu1 %v171_v6  ;;  %542 = vmatprep.subr.mxu0 %v271_v13  ;;  %v472_v30 = vld [vmem:[%s746_s4] ss:$0 sm:$0xff]  ;;  %v365_v39 = vld [vmem:[#allocation6 + $0x8] sm:$0xff] }
  0x2e   :  { %526 = vmatpush3.msra.mxu1 %v171_v6  ;;  %543 = vmatpush3.msra.mxu0 %v271_v13  ;;  %v364_v40 = vld [vmem:[#allocation6] sm:$0xff] }
  0x2f   :  { %527 = vmatprep.subr.mxu1 %v170_v7  ;;  %544 = vmatprep.subr.mxu0 %v270_v14  ;;  %v475_v41 = vld [vmem:[%s748_s6] ss:$0 sm:$0xff] }
  0x30   :  { %528 = vmatpush3.msra.mxu1 %v170_v7  ;;  %545 = vmatpush3.msra.mxu0 %v270_v14  ;;  %v478_v48 = vld [vmem:[%s750_s8] ss:$0 sm:$0xff] }
  0x31   :  { %529 = vmatprep.subr.mxu1 %v169_v8  ;;  %546 = vmatprep.subr.mxu0 %v269_v22 }
  0x32   :  { %530 = vmatpush3.msra.mxu1 %v169_v8  ;;  %547 = vmatpush3.msra.mxu0 %v269_v22 }
  0x33   :  { %531 = vmatprep.subr.mxu1 %v168_v9  ;;  %548 = vmatprep.subr.mxu0 %v268_v23 }
  0x34   :  { %532 = vmatpush3.msra.mxu1 %v168_v9  ;;  %549 = vmatpush3.msra.mxu0 %v268_v23 }
  0x35   :  { %533 = vmatprep.subr.mxu1 %v167_v10  ;;  %550 = vmatprep.subr.mxu0 %v267_v24 }
  0x36   :  { %534 = vmatpush3.msra.mxu1 %v167_v10  ;;  %551 = vmatpush3.msra.mxu0 %v267_v24 }
  0x37   :  { %552 = vmatprep.subr.mxu0 %v266_v25  ;;  %557 = vmatprep.subr.mxu1 %v371_v26 }
  0x38   :  { %553 = vmatpush3.msra.mxu0 %v266_v25 }
  0xe7   :  { %v518_v16 = vpop.f32.mrf.mxu0 }
  0xe8   :  { %v162_v17 = vadd.f32 %v518_v16, %v469_v15 }
  0xe9   :  { %v156_v18 = vpop.f32.mrf.mxu0 }
  0xea   :  { %v157_v19 = vadd.f32 %v469_v15, %v156_v18  ;;  %v166_v21 = vmax.f32 %v162_v17, 0.0 }
  0xec   :  { %v165_v20 = vmax.f32 %v157_v19, 0.0 }
  0xee   :  { %535 = vmatprep.mubr.msk.f32.mxu1 %vm182_vm1, %v165_v20 }
  0xef   :  { %536 = vmatmul.mubr.msk.f32.vlgmr.msra.gmra.mxu1 %vm182_vm1, %v166_v21 }
  0xf0   :  { %558 = vmatpush3.msra.mxu1 %v371_v26 }
  0xf1   :  { %559 = vmatprep.subr.mxu1 %v370_v27 }
  0xf2   :  { %560 = vmatpush3.msra.mxu1 %v370_v27 }
  0xf3   :  { %561 = vmatprep.subr.mxu1 %v369_v28 }
  0xf4   :  { %562 = vmatpush3.msra.mxu1 %v369_v28 }
  0xf5   :  { %563 = vmatprep.subr.mxu1 %v368_v29 }
  0xf6   :  { %564 = vmatpush3.msra.mxu1 %v368_v29 }
  0xf7   :  { %565 = vmatprep.subr.mxu1 %v367_v37 }
  0xf8   :  { %566 = vmatpush3.msra.mxu1 %v367_v37 }
  0xf9   :  { %567 = vmatprep.subr.mxu1 %v366_v38 }
  0xfa   :  { %568 = vmatpush3.msra.mxu1 %v366_v38 }
  0xfb   :  { %569 = vmatprep.subr.mxu1 %v365_v39 }
  0xfc   :  { %570 = vmatpush3.msra.mxu1 %v365_v39 }
  0xfd   :  { %571 = vmatprep.subr.mxu1 %v364_v40 }
  0xfe   :  { %572 = vmatpush3.msra.mxu1 %v364_v40 }
 0x1af   :  { %v537_v31 = vpop.f32.mrf.mxu1 }
 0x1b0   :  { %v261_v32 = vadd.f32 %v537_v31, %v472_v30 }
 0x1b1   :  { %v255_v33 = vpop.f32.mrf.mxu1 }
 0x1b2   :  { %v256_v34 = vadd.f32 %v472_v30, %v255_v33  ;;  %v265_v36 = vmax.f32 %v261_v32, 0.0 }
 0x1b4   :  { %v264_v35 = vmax.f32 %v256_v34, 0.0 }
 0x1b6   :  { %554 = vmatprep.mubr.msk.f32.mxu0 %vm182_vm1, %v264_v35 }
 0x1b7   :  { %555 = vmatmul.mubr.msk.f32.vlgmr.msra.gmra.mxu0 %vm182_vm1, %v265_v36 }
 0x277   :  { %v556_v42 = vpop.f32.mrf.mxu0 }
 0x278   :  { %v359_v43 = vadd.f32 %v556_v42, %v475_v41 }
 0x279   :  { %v353_v44 = vpop.f32.mrf.mxu0 }
 0x27a   :  { %v354_v45 = vadd.f32 %v475_v41, %v353_v44  ;;  %v363_v47 = vmax.f32 %v359_v43, 0.0 }
 0x27c   :  { %v362_v46 = vmax.f32 %v354_v45, 0.0 }
 0x27e   :  { %573 = vmatprep.mubr.msk.f32.mxu1 %vm182_vm1, %v362_v46 }
 0x27f   :  { %574 = vmatmul.mubr.msk.f32.vlgmr.msra.gmra.mxu1 %vm182_vm1, %v363_v47 }
 0x33f   :  { %v575_v49 = vpop.f32.mrf.mxu1 }
 0x340   :  { %v457_v50 = vadd.f32 %v575_v49, %v478_v48 }
 0x341   :  { %v451_v51 = vpop.f32.mrf.mxu1 }
 0x342   :  { %462 = vst.msk [vmem:[%s751_s9 + $0x8] sm:$0xff] %vm460_vm2, %v457_v50  ;;  %v452_v52 = vadd.f32 %v478_v48, %v451_v51 }
 0x344   :  { %461 = vst.msk [vmem:[%s751_s9] sm:$0xff] %vm460_vm2, %v452_v52 }
 0x345   :  { %467 = vsyncpa [#allocation3], 1 }
 0x346   :  { %468 = vsyncpa [#allocation5], 1 }

</bundles_post_ra>
